<compile_context>
chip_gen: v7x
topology: tpu7x:2x2x1
jax: 0.10.0
libtpu: 0.0.40
codegen_flags: <defaults>
</compile_context>

<pallas_src>
from functools import partial

import jax
import jax.numpy as jnp
from jax import lax
from jax.experimental import pallas as pl
from jax.experimental.pallas import tpu as pltpu

# timm LayerNorm2d default eps (NOT torch.nn.LayerNorm's 1e-5); configurable in
# prepare_head_params if the actual module was built with a different eps.
LN_EPS = 1e-6


def _round_up(x, m):
    return ((x + m - 1) // m) * m


# ---------------------------------------------------------------------------
# Kernel
# ---------------------------------------------------------------------------
def _head_kernel(x_ref, w1_ref, b1_ref, wh_ref, bh_ref, out_ref, psum_ref,
                 *, hw_total, hw_chunk, needs_mask, eps, inv_hw):
    """grid = (batch blocks [parallel], HW chunks [arbitrary, reduction])."""
    k = pl.program_id(1)
    nk = pl.num_programs(1)

    @pl.when(k == 0)
    def _():
        psum_ref[...] = jnp.zeros_like(psum_ref)

    # Partial spatial sum for the global average pool (accumulate in f32).
    x = x_ref[...].astype(jnp.float32)                    # (TB, C, hw_chunk)
    if needs_mask:
        col = lax.broadcasted_iota(jnp.int32, x.shape, dimension=2)
        x = jnp.where(k * hw_chunk + col < hw_total, x, 0.0)
    psum_ref[...] += jnp.sum(x, axis=-1)                  # (TB, C)
    # TODO(synk): if a bundle dump shows the XLU cross-lane reduce binding on
    # v7x, pre-reduce HW to 128 lanes with VPU adds before the final reduce.

    @pl.when(k == nk - 1)
    def _():
        pooled = psum_ref[...] * inv_hw                   # (TB, C) avg pool
        # LayerNorm2d over C; affine (gamma/beta) is folded into w1/b1.
        mu = jnp.mean(pooled, axis=-1, keepdims=True)
        var = jnp.mean((pooled - mu) ** 2, axis=-1, keepdims=True)
        xn = (pooled - mu) * lax.rsqrt(var + eps)
        # pre_logits FC + tanh (dropout rates are 0 -> identity).
        h = jnp.tanh(
            jnp.dot(xn, w1_ref[...], preferred_element_type=jnp.float32)
            + b1_ref[...]
        )                                                 # (TB, Hp)
        # Fused decoupled heads: one lane-dense matmul, one unmasked store.
        out_ref[...] = (
            jnp.dot(h, wh_ref[...], preferred_element_type=jnp.float32)
            + bh_ref[...]
        )                                                 # (TB, NP)


# ---------------------------------------------------------------------------
# Tiling / VMEM sizing (generation aware)
# ---------------------------------------------------------------------------
def _vmem_capacity_bytes():
    try:
        return int(pltpu.get_tpu_info().vmem_capacity_bytes)
    except Exception:
        return 64 << 20          # conservative (v7x-sized) fallback


def _choose_tiling(B, C, HW, x_itemsize, vmem_cap):
    """Pick (TB, HW_CHUNK): double-buffered x tile within the VMEM budget."""
    x_budget = max(8 << 20, min(vmem_cap // 4, 48 << 20))
    TB_CAP = 512

    # Lane-axis (HW) chunk: keep full rows when a >=64-row double-buffered tile
    # already fits; otherwise chop HW into multiples of 128 so TB stays large.
    row_bytes = C * HW * x_itemsize
    if HW <= 128 or 2 * 64 * row_bytes <= x_budget:
        hw_chunk = HW
    else:
        per_row_budget = x_budget // (2 * 128)            # aim for TB ~= 128
        hw_chunk = (per_row_budget // (C * x_itemsize)) // 128 * 128
        hw_chunk = int(max(128, min(hw_chunk, HW)))
        if hw_chunk >= HW:
            hw_chunk = HW

    chunk_row_bytes = max(1, C * hw_chunk * x_itemsize)
    tb = x_budget // (2 * chunk_row_bytes)
    tb = max(8, min(TB_CAP, (tb // 8) * 8, _round_up(B, 8)))
    # Guarantee >=2 "parallel" grid steps so both v7x TensorCores get work
    # (cost on single-TC v5e/v6e is one ~0.35us step of overhead).
    if B >= 16:
        tb = max(8, min(tb, _round_up((B + 1) // 2, 8)))
    return int(tb), int(hw_chunk)


def _vmem_limit_bytes(tb, C, hw_chunk, Hp, NP, x_itemsize, vmem_cap):
    need = (
        2 * tb * C * hw_chunk * x_itemsize        # x double buffer
        + 2 * tb * NP * 4                         # output double buffer
        + 2 * (C * Hp + 8 * Hp + Hp * NP + 8 * NP) * 4   # resident params
        + tb * C * 4                              # partial-sum scratch
    )
    # Never below the default scoped limit (16/32 MiB), generous headroom,
    # capped at 3/4 of physical VMEM (64 MiB on v7x, 128 MiB on v5e/v6e).
    return int(min(max(32 << 20, 2 * need + (8 << 20)), (vmem_cap * 3) // 4))


# ---------------------------------------------------------------------------
# Parameter preparation (call once at model load, not per forward)
# ---------------------------------------------------------------------------
def prepare_head_params(params, *, eps=LN_EPS):
    C, hidden = params["w1"].shape
    cls_out = params["wc"].shape[1]
    reg_out = params["wr"].shape[1]
    Hp = _round_up(hidden, 128)                  # lane-dense hidden
    NP = _round_up(cls_out + reg_out, 128)       # lane-dense fused head output

    gamma = params["gamma"].astype(jnp.float32)
    beta = params["beta"].astype(jnp.float32)
    w1 = params["w1"].astype(jnp.float32)
    b1 = params["b1"].astype(jnp.float32)

    # Fold LN affine into FC1: (xn*g + b) @ W1 + b1 = xn @ (g[:,None]*W1) + (b@W1 + b1)
    w1f = gamma[:, None] * w1
    b1f = b1 + beta @ w1                         # only over real hidden cols

    w1p = jnp.zeros((C, Hp), jnp.float32).at[:, :hidden].set(w1f)
    b1p = jnp.zeros((1, Hp), jnp.float32).at[0, :hidden].set(b1f)  # padded cols stay 0

    whp = jnp.zeros((Hp, NP), jnp.float32)
    whp = whp.at[:hidden, :cls_out].set(params["wc"].astype(jnp.float32))
    whp = whp.at[:hidden, cls_out:cls_out + reg_out].set(params["wr"].astype(jnp.float32))
    bhp = jnp.zeros((1, NP), jnp.float32)
    bhp = bhp.at[0, :cls_out].set(params["bc"].astype(jnp.float32))
    bhp = bhp.at[0, cls_out:cls_out + reg_out].set(params["br"].astype(jnp.float32))

    return dict(w1p=w1p, b1p=b1p, whp=whp, bhp=bhp,
                C=int(C), hidden=int(hidden), cls_out=int(cls_out),
                reg_out=int(reg_out), Hp=int(Hp), NP=int(NP), eps=float(eps))


# ---------------------------------------------------------------------------
# Forward
# ---------------------------------------------------------------------------
def decoupled_regression_head(x_nchw, prepared, *, use_pallas=None,
                              tb=None, hw_chunk=None):
    """x_nchw: (B, C, H, W).  Returns (cls_logits, reg_logits).

    `tb` (multiple of 8) / `hw_chunk` (multiple of 128 or == H*W) override the
    automatic tiling (mainly for tests)."""
    B, C, H, W = x_nchw.shape
    assert C == prepared["C"]
    HW = H * W
    cls_out, reg_out = prepared["cls_out"], prepared["reg_out"]

    if use_pallas is None:
        use_pallas = B >= 64     # tiny-batch fallback: XLA fusion wins at small B
    if not use_pallas:
        pooled = jnp.mean(x_nchw.astype(jnp.float32), axis=(2, 3))
        mu = jnp.mean(pooled, axis=-1, keepdims=True)
        var = jnp.mean((pooled - mu) ** 2, axis=-1, keepdims=True)
        xn = (pooled - mu) * lax.rsqrt(var + prepared["eps"])
        h = jnp.tanh(xn @ prepared["w1p"] + prepared["b1p"])
        out = h @ prepared["whp"] + prepared["bhp"]
        return out[:, :cls_out], out[:, cls_out:cls_out + reg_out]

    # Keep the input dtype (bf16 x halves the dominant HBM read).
    x = x_nchw.reshape(B, C, HW)
    vmem_cap = _vmem_capacity_bytes()
    if tb is None or hw_chunk is None:
        tb_auto, hw_auto = _choose_tiling(B, C, HW, x.dtype.itemsize, vmem_cap)
        tb = tb if tb is not None else tb_auto
        hw_chunk = hw_chunk if hw_chunk is not None else hw_auto

    nb = pl.cdiv(B, tb)
    nk = pl.cdiv(HW, hw_chunk)
    needs_mask = (HW % hw_chunk) != 0
    Bp = nb * tb                      # padded *output* rows only (no pad of x);
    Hp, NP = prepared["Hp"], prepared["NP"]   # garbage edge rows sliced off below.

    kernel = partial(_head_kernel, hw_total=HW, hw_chunk=hw_chunk,
                     needs_mask=needs_mask, eps=prepared["eps"], inv_hw=1.0 / HW)

    cost = pl.CostEstimate(
        flops=int(2 * B * (C * HW + C * Hp + Hp * NP)),
        transcendentals=int(B * Hp),
        bytes_accessed=int(B * C * HW * x.dtype.itemsize
                           + (C * Hp + Hp + Hp * NP + NP + Bp * NP) * 4),
    )

    out = pl.pallas_call(
        kernel,
        out_shape=jax.ShapeDtypeStruct((Bp, NP), jnp.float32),
        grid=(nb, nk),
        in_specs=[
            pl.BlockSpec((tb, C, hw_chunk), lambda i, k: (i, 0, k)),  # x tile
            pl.BlockSpec((C, Hp), lambda i, k: (0, 0)),               # fused FC1 W (resident)
            pl.BlockSpec((1, Hp), lambda i, k: (0, 0)),               # fused FC1 b
            pl.BlockSpec((Hp, NP), lambda i, k: (0, 0)),              # fused heads W
            pl.BlockSpec((1, NP), lambda i, k: (0, 0)),               # fused heads b
        ],
        out_specs=pl.BlockSpec((tb, NP), lambda i, k: (i, 0)),
        scratch_shapes=[pltpu.VMEM((tb, C), jnp.float32)],            # spatial partial sum
        compiler_params=pltpu.CompilerParams(
            dimension_semantics=("parallel", "arbitrary"),
            vmem_limit_bytes=_vmem_limit_bytes(tb, C, hw_chunk, Hp, NP,
                                               x.dtype.itemsize, vmem_cap),
        ),
        cost_estimate=cost,
    )(x, prepared["w1p"], prepared["b1p"], prepared["whp"], prepared["bhp"])

    cls_logits = out[:B, :cls_out]
    reg_logits = out[:B, cls_out:cls_out + reg_out]
    return cls_logits, reg_logits


# ---------------------------------------------------------------------------
# Pure-JAX reference (mirrors the PyTorch forward on the raw parameters)
# ---------------------------------------------------------------------------
def _reference(x_nchw, params):
    pooled = jnp.mean(x_nchw.astype(jnp.float32), axis=(2, 3))   # (B, C)
    mu = jnp.mean(pooled, axis=-1, keepdims=True)
    var = jnp.mean((pooled - mu) ** 2, axis=-1, keepdims=True)
    xn = (pooled - mu) / jnp.sqrt(var + LN_EPS)
    xn = xn * params["gamma"] + params["beta"]
    h = jnp.tanh(xn @ params["w1"] + params["b1"])
    cls = h @ params["wc"] + params["bc"]
    reg = h @ params["wr"] + params["br"]
    return cls, reg


if __name__ == "__main__":
    # Shapes consistent with the module: in_features=16, hidden=32,
    # cls_out_dim=3, reg_out_dim=2, input (B=2, C=16, H=16, W=16) NCHW.
    B, C, H, W = 2, 16, 16, 16
    hidden, cls_out, reg_out = 32, 3, 2

    key = jax.random.PRNGKey(0)
    ks = jax.random.split(key, 9)

    x = jax.random.normal(ks[0], (B, C, H, W), dtype=jnp.float32)
    params = {
        # LayerNorm2d affine params (random so the affine-folding is exercised)
        "gamma": 1.0 + 0.1 * jax.random.normal(ks[7], (C,), jnp.float32),
        "beta": 0.05 * jax.random.normal(ks[8], (C,), jnp.float32),
        # pre_logits FC: Linear(C, hidden) stored as (in, out)
        "w1": jax.random.normal(ks[1], (C, hidden), jnp.float32) * 0.1,
        "b1": jax.random.normal(ks[2], (hidden,), jnp.float32) * 0.1,
        # cls_fc: Linear(hidden, cls_out)
        "wc": jax.random.normal(ks[3], (hidden, cls_out), jnp.float32) * 0.1,
        "bc": jax.random.normal(ks[4], (cls_out,), jnp.float32) * 0.1,
        # reg_fc: Linear(hidden, reg_out)
        "wr": jax.random.normal(ks[5], (hidden, reg_out), jnp.float32) * 0.1,
        "br": jax.random.normal(ks[6], (reg_out,), jnp.float32) * 0.1,
    }
    prepared = prepare_head_params(params)

    # --- test 1: module-default small shapes, single-spatial-chunk path ------
    cls_p, reg_p = decoupled_regression_head(x, prepared, use_pallas=True)
    jax.block_until_ready((cls_p, reg_p))
    cls_r, reg_r = _reference(x, params)
    assert cls_p.shape == (B, cls_out) and reg_p.shape == (B, reg_out)
    assert jnp.allclose(cls_p, cls_r, atol=1e-4, rtol=1e-4)
    assert jnp.allclose(reg_p, reg_r, atol=1e-4, rtol=1e-4)

    # --- test 2: non-divisible batch (edge block, no jnp.pad of x) + forced
    #             spatial chunking with a masked HW tail ----------------------
    B2, H2, W2 = 37, 12, 12                       # HW = 144: 128-chunk + tail
    x2 = jax.random.normal(jax.random.PRNGKey(1), (B2, C, H2, W2), jnp.float32)
    cls_p2, reg_p2 = decoupled_regression_head(x2, prepared, use_pallas=True,
                                               tb=16, hw_chunk=128)
    jax.block_until_ready((cls_p2, reg_p2))
    cls_r2, reg_r2 = _reference(x2, params)
    assert cls_p2.shape == (B2, cls_out) and reg_p2.shape == (B2, reg_out)
    assert jnp.allclose(cls_p2, cls_r2, atol=1e-4, rtol=1e-4)
    assert jnp.allclose(reg_p2, reg_r2, atol=1e-4, rtol=1e-4)

    print("KERNEL_OK")
</pallas_src>

<mosaic_0001>
module attributes {stable_mosaic.version = 11 : i64} {
  func.func @_head_kernel(%arg0: i32, %arg1: i32, %arg2: memref<8x16x256xf32, #tpu.memory_space<vmem>>, %arg3: memref<16x128xf32, #tpu.memory_space<vmem>>, %arg4: memref<1x128xf32, #tpu.memory_space<vmem>>, %arg5: memref<128x128xf32, #tpu.memory_space<vmem>>, %arg6: memref<1x128xf32, #tpu.memory_space<vmem>>, %arg7: memref<8x128xf32, #tpu.memory_space<vmem>>, %arg8: memref<8x16xf32, #tpu.memory_space<vmem>>) attributes {dimension_semantics = [#tpu.dimension_semantics<parallel>, #tpu.dimension_semantics<arbitrary>], iteration_bounds = array<i64: 1, 1>, scalar_prefetch = 0 : i64, scratch_operands = 1 : i64, tpu.core_type = #tpu.core_type<tc>, window_params = [{transform_indices = @transform_0, window_bounds = array<i64: 8, 16, 256>}, {pipeline_mode = #tpu.pipeline_mode<synchronous>, transform_indices = @transform_1, window_bounds = array<i64: 16, 128>}, {pipeline_mode = #tpu.pipeline_mode<synchronous>, transform_indices = @transform_2, window_bounds = array<i64: 1, 128>}, {pipeline_mode = #tpu.pipeline_mode<synchronous>, transform_indices = @transform_3, window_bounds = array<i64: 128, 128>}, {pipeline_mode = #tpu.pipeline_mode<synchronous>, transform_indices = @transform_4, window_bounds = array<i64: 1, 128>}, {transform_indices = @transform_5, window_bounds = array<i64: 8, 128>}]} {
    %c0_i32 = arith.constant 0 : i32
    %0 = arith.cmpi eq, %arg1, %c0_i32 : i32
    %1 = arith.extui %0 : i1 to i32
    %c0_i32_0 = arith.constant 0 : i32
    %2 = arith.cmpi ne, %1, %c0_i32_0 : i32
    scf.if %2 {
      %cst_9 = arith.constant 0.000000e+00 : f32
      %11 = vector.broadcast %cst_9 : f32 to vector<8x16xf32>
      %c0_10 = arith.constant 0 : index
      %c0_11 = arith.constant 0 : index
      %12 = vector.load %arg8[%c0_10, %c0_11] : memref<8x16xf32, #tpu.memory_space<vmem>>, vector<8x16xf32>
      tpu.vector_store %arg8[%c0_10, %c0_11], %11 {strides = array<i32>} : memref<8x16xf32, #tpu.memory_space<vmem>>, vector<8x16xf32>,
    } else {
    }
    %c0 = arith.constant 0 : index
    %c0_1 = arith.constant 0 : index
    %c0_2 = arith.constant 0 : index
    %3 = vector.load %arg2[%c0, %c0_1, %c0_2] : memref<8x16x256xf32, #tpu.memory_space<vmem>>, vector<8x16x256xf32>
    %c0_3 = arith.constant 0 : index
    %c0_4 = arith.constant 0 : index
    %4 = vector.load %arg8[%c0_3, %c0_4] : memref<8x16xf32, #tpu.memory_space<vmem>>, vector<8x16xf32>
    %cst = arith.constant dense<0.000000e+00> : vector<8x16xf32>
    %5 = vector.multi_reduction <add>, %3, %cst [2] : vector<8x16x256xf32> to vector<8x16xf32>
    %6 = arith.addf %4, %5 : vector<8x16xf32>
    %c0_5 = arith.constant 0 : index
    %c0_6 = arith.constant 0 : index
    %7 = vector.load %arg8[%c0_5, %c0_6] : memref<8x16xf32, #tpu.memory_space<vmem>>, vector<8x16xf32>
    tpu.vector_store %arg8[%c0_5, %c0_6], %6 {strides = array<i32>} : memref<8x16xf32, #tpu.memory_space<vmem>>, vector<8x16xf32>,
    %c0_i32_7 = arith.constant 0 : i32
    %8 = arith.cmpi eq, %arg1, %c0_i32_7 : i32
    %9 = arith.extui %8 : i1 to i32
    %c0_i32_8 = arith.constant 0 : i32
    %10 = arith.cmpi ne, %9, %c0_i32_8 : i32
    scf.if %10 {
      %c0_9 = arith.constant 0 : index
      %c0_10 = arith.constant 0 : index
      %11 = vector.load %arg8[%c0_9, %c0_10] : memref<8x16xf32, #tpu.memory_space<vmem>>, vector<8x16xf32>
      %cst_11 = arith.constant 3.906250e-03 : f32
      %12 = vector.broadcast %cst_11 : f32 to vector<8x16xf32>
      %13 = arith.mulf %11, %12 : vector<8x16xf32>
      %cst_12 = arith.constant dense<0.000000e+00> : vector<8xf32>
      %14 = vector.multi_reduction <add>, %13, %cst_12 [1] : vector<8x16xf32> to vector<8xf32>
      %15 = vector.shape_cast %14 : vector<8xf32> to vector<8x1xf32>
      %cst_13 = arith.constant 1.600000e+01 : f32
      %16 = vector.broadcast %cst_13 : f32 to vector<8x1xf32>
      %17 = arith.divf %15, %16 : vector<8x1xf32>
      %18 = vector.broadcast %17 : vector<8x1xf32> to vector<8x16xf32>
      %19 = arith.subf %13, %18 : vector<8x16xf32>
      %20 = arith.mulf %19, %19 : vector<8x16xf32>
      %cst_14 = arith.constant dense<0.000000e+00> : vector<8xf32>
      %21 = vector.multi_reduction <add>, %20, %cst_14 [1] : vector<8x16xf32> to vector<8xf32>
      %22 = vector.shape_cast %21 : vector<8xf32> to vector<8x1xf32>
      %cst_15 = arith.constant 1.600000e+01 : f32
      %23 = vector.broadcast %cst_15 : f32 to vector<8x1xf32>
      %24 = arith.divf %22, %23 : vector<8x1xf32>
      %25 = vector.broadcast %17 : vector<8x1xf32> to vector<8x16xf32>
      %26 = arith.subf %13, %25 : vector<8x16xf32>
      %cst_16 = arith.constant 9.99999997E-7 : f32
      %27 = vector.broadcast %cst_16 : f32 to vector<8x1xf32>
      %28 = arith.addf %24, %27 : vector<8x1xf32>
      %29 = math.rsqrt %28 : vector<8x1xf32>
      %30 = vector.broadcast %29 : vector<8x1xf32> to vector<8x16xf32>
      %31 = arith.mulf %26, %30 : vector<8x16xf32>
      %c0_17 = arith.constant 0 : index
      %c0_18 = arith.constant 0 : index
      %32 = vector.load %arg3[%c0_17, %c0_18] : memref<16x128xf32, #tpu.memory_space<vmem>>, vector<16x128xf32>
      %cst_19 = arith.constant dense<0.000000e+00> : vector<8x128xf32>
      %33 = tpu.matmul %31, %32, %cst_19 {dimension_numbers = #tpu.dot_dimension_numbers<[1], [0], [0], [1], [0, 0, 1, 1], [], []>} : vector<8x16xf32>, vector<16x128xf32>, vector<8x128xf32> -> vector<8x128xf32>
      %c0_20 = arith.constant 0 : index
      %c0_21 = arith.constant 0 : index
      %34 = vector.load %arg4[%c0_20, %c0_21] : memref<1x128xf32, #tpu.memory_space<vmem>>, vector<1x128xf32>
      %35 = vector.broadcast %34 : vector<1x128xf32> to vector<8x128xf32>
      %36 = arith.addf %33, %35 : vector<8x128xf32>
      %37 = math.tanh %36 : vector<8x128xf32>
      %c0_22 = arith.constant 0 : index
      %c0_23 = arith.constant 0 : index
      %38 = vector.load %arg5[%c0_22, %c0_23] : memref<128x128xf32, #tpu.memory_space<vmem>>, vector<128x128xf32>
      %cst_24 = arith.constant dense<0.000000e+00> : vector<8x128xf32>
      %39 = tpu.matmul %37, %38, %cst_24 {dimension_numbers = #tpu.dot_dimension_numbers<[1], [0], [0], [1], [0, 0, 1, 1], [], []>} : vector<8x128xf32>, vector<128x128xf32>, vector<8x128xf32> -> vector<8x128xf32>
      %c0_25 = arith.constant 0 : index
      %c0_26 = arith.constant 0 : index
      %40 = vector.load %arg6[%c0_25, %c0_26] : memref<1x128xf32, #tpu.memory_space<vmem>>, vector<1x128xf32>
      %41 = vector.broadcast %40 : vector<1x128xf32> to vector<8x128xf32>
      %42 = arith.addf %39, %41 : vector<8x128xf32>
      %c0_27 = arith.constant 0 : index
      %c0_28 = arith.constant 0 : index
      %43 = vector.load %arg7[%c0_27, %c0_28] : memref<8x128xf32, #tpu.memory_space<vmem>>, vector<8x128xf32>
      tpu.vector_store %arg7[%c0_27, %c0_28], %42 {strides = array<i32>} : memref<8x128xf32, #tpu.memory_space<vmem>>, vector<8x128xf32>,
    } else {
    }
    return
  }
  func.func @transform_0(%arg0: i32, %arg1: i32) -> (i32, i32, i32) {
    %c0_i32 = arith.constant 0 : i32
    %c0_i32_0 = arith.constant 0 : i32
    return %arg0, %c0_i32, %arg1 : i32, i32, i32
  }
  func.func @transform_1(%arg0: i32, %arg1: i32) -> (i32, i32) {
    %c0_i32 = arith.constant 0 : i32
    %c0_i32_0 = arith.constant 0 : i32
    %c0_i32_1 = arith.constant 0 : i32
    return %c0_i32, %c0_i32_0 : i32, i32
  }
  func.func @transform_2(%arg0: i32, %arg1: i32) -> (i32, i32) {
    %c0_i32 = arith.constant 0 : i32
    %c0_i32_0 = arith.constant 0 : i32
    %c0_i32_1 = arith.constant 0 : i32
    return %c0_i32, %c0_i32_0 : i32, i32
  }
  func.func @transform_3(%arg0: i32, %arg1: i32) -> (i32, i32) {
    %c0_i32 = arith.constant 0 : i32
    %c0_i32_0 = arith.constant 0 : i32
    %c0_i32_1 = arith.constant 0 : i32
    return %c0_i32, %c0_i32_0 : i32, i32
  }
  func.func @transform_4(%arg0: i32, %arg1: i32) -> (i32, i32) {
    %c0_i32 = arith.constant 0 : i32
    %c0_i32_0 = arith.constant 0 : i32
    %c0_i32_1 = arith.constant 0 : i32
    return %c0_i32, %c0_i32_0 : i32, i32
  }
  func.func @transform_5(%arg0: i32, %arg1: i32) -> (i32, i32) {
    %c0_i32 = arith.constant 0 : i32
    %c0_i32_0 = arith.constant 0 : i32
    return %arg0, %c0_i32 : i32, i32
  }
}

</mosaic_0001>

<bundles_post_ra>
// kernel: tpu_custom_call.1
= control target key start
LH: loop header
LB: loop body
LE: loop exit
PB: predicated region body
PF: predicated region fallthrough
CT: control target
= control target key end

     0   :  { %10 = vsyncpa [#allocation4], 0  ;;  %s789_s0 = inlined_call_operand.hbm [shape: f32[2,16,256], index: 0, kind: input, shape index: {}]   ;;  %s790_s1 = inlined_call_operand.hbm [shape: f32[16,128], index: 1, kind: input, shape index: {}]   ;;  %s791_s2 = inlined_call_operand.vmem [shape: f32[1,128], index: 2, kind: input, shape index: {}]   ;;  %s792_s3 = inlined_call_operand.hbm [shape: f32[128,128], index: 3, kind: input, shape index: {}]   ;;  %s793_s4 = inlined_call_operand.vmem [shape: f32[1,128], index: 4, kind: input, shape index: {}]   ;;  %s794_s5 = inlined_call_operand.hbm [shape: f32[8,128], index: 5, kind: output, shape index: {}]  }
   0x1   :  { %11 = vsyncpa [#allocation7], 0 }
   0x2   :  { %12 = vsyncpa [#allocation5], 0 }
   0x3   :  { %17 = vsyncadd [#allocation4], 3072  ;;  %s672_s18 = smov [#allocation6]   ;;  %s578_s22 = scalar_lea.hbm %s790_s1, 256 }
   0x4   :  { %s30_s19 = sshll.u32 %s672_s18, 4  ;;  %p579_p0 = scmp.ne.s32.totalorder %s790_s1, %s578_s22  ;;  %s31_s19 = int_to_ptr.vmem [resolvable:$true] %s30_s19 }
   0x5   :  { %p582_p1 = scmp.lt.u32.totalorder %s578_s22, %s790_s1 }
   0x7   :  { %p584_p2 = pnand %p582_p1, %p579_p0 }
   0x9   :  { %587 = shalt.err (!%p584_p2)
}
   0xa   :  { %s588_s27 = scalar_lea.vmem %s31_s19, 256  ;;  %p593_p4 = scmp.lt.s32.totalorder %s31_s19, %s31_s19 }
   0xb   :  { %p589_p3 = scmp.ne.s32.totalorder %s31_s19, %s588_s27  ;;  %p594_p5 = scmp.lt.s32.totalorder %s588_s27, %s588_s27 }
   0xd   :  { %p595_p6 = por %p594_p5, %p593_p4 }
   0xf   :  { %p596_p7 = pnand %p595_p6, %p589_p3 }
  0x11   :  { %599 = shalt.err (!%p596_p7)
}
  0x12   :  { %s673_s28 = smov 128   ;;  %s674_s29 = smov 8  }
  0x13   :  { %36 = dma.hbm_to_vmem [thread:$0]  %s790_s1, 256, %s31_s19, [#allocation7], %s673_s28, %s673_s28, %s674_s29  }
  0x14   :  { %s675_s7 = smov [#allocation3]   ;;  %s600_s11 = scalar_lea.hbm %s789_s0, 1024 }
  0x15   :  { %s18_s8 = sshll.u32 %s675_s7, 4  ;;  %p601_p8 = scmp.ne.s32.totalorder %s789_s0, %s600_s11  ;;  %s19_s8 = int_to_ptr.vmem [resolvable:$true] %s18_s8 }
  0x16   :  { %p604_p9 = scmp.lt.u32.totalorder %s600_s11, %s789_s0 }
  0x18   :  { %p606_p10 = pnand %p604_p9, %p601_p8 }
  0x1a   :  { %609 = shalt.err (!%p606_p10)
}
  0x1b   :  { %s610_s16 = scalar_lea.vmem %s19_s8, 1024  ;;  %s614_s1 = scalar_lea.vmem %s19_s8, 4096 }
  0x1c   :  { %p611_p11 = scmp.ne.s32.totalorder %s19_s8, %s610_s16  ;;  %p615_p12 = scmp.lt.s32.totalorder %s19_s8, %s19_s8 }
  0x1d   :  { %p616_p13 = scmp.lt.s32.totalorder %s614_s1, %s610_s16 }
  0x1f   :  { %p617_p0 = por %p616_p13, %p615_p12 }
  0x21   :  { %p618_p1 = pnand %p617_p0, %p611_p11 }
  0x23   :  { %621 = shalt.err (!%p618_p1)
}
  0x24   :  { %s676_s17 = smov 256   ;;  %s677_s18 = smov 16  }
  0x25   :  { %24 = dma.hbm_to_vmem [thread:$0]  %s789_s0, 1024, %s19_s8, [#allocation4], %s676_s17, %s676_s17, %s677_s18  }
  0x26   :  { %s678_s21 = smov [#allocation8]   ;;  %s622_s25 = scalar_lea.hbm %s792_s3, 2048 }
  0x27   :  { %s44_s22 = sshll.u32 %s678_s21, 4  ;;  %p623_p2 = scmp.ne.s32.totalorder %s792_s3, %s622_s25  ;;  %s45_s22 = int_to_ptr.vmem [resolvable:$true] %s44_s22 }
  0x28   :  { %p626_p3 = scmp.lt.u32.totalorder %s622_s25, %s792_s3 }
  0x2a   :  { %p628_p4 = pnand %p626_p3, %p623_p2 }
  0x2c   :  { %631 = shalt.err (!%p628_p4)
}
  0x2d   :  { %s632_s7 = scalar_lea.vmem %s45_s22, 2048  ;;  %p637_p6 = scmp.lt.s32.totalorder %s45_s22, %s45_s22 }
  0x2e   :  { %p633_p5 = scmp.ne.s32.totalorder %s45_s22, %s632_s7  ;;  %p638_p7 = scmp.lt.s32.totalorder %s632_s7, %s632_s7 }
  0x30   :  { %p639_p8 = por %p638_p7, %p637_p6 }
  0x32   :  { %p640_p9 = pnand %p639_p8, %p633_p5 }
  0x34   :  { %643 = shalt.err (!%p640_p9)
}
  0x35   :  { %50 = dma.hbm_to_vmem [thread:$0]  %s792_s3, 2048, %s45_s22, [#allocation7], %s673_s28, %s673_s28, %s674_s29  }
  0x36   :  { %666 = dma.done.wait [#allocation4], 4096  }
  0x37   :  { %667 = vsyncadd [#allocation4], 4294963200 }
  0x38   :  { %668 = dma.done.wait [#allocation7], 2304  }
  0x39   :  { %669 = vsyncadd [#allocation7], 4294964992  ;;  %v72_v0 = vld [vmem:[#allocation3 + $0x20] sm:$0xff]  ;;  %v73_v1 = vld [vmem:[#allocation3 + $0x28] sm:$0xff]  ;;  %vm66_vm0 = vcmask 130048   ;;  %v679_v48 = vmov 0.0   ;;  %v165_v53 = vlaneseq }
  0x3a   :  { %v68_v2 = vld [vmem:[#allocation3] sm:$0xff]  ;;  %v107_v3 = vadd.f32 %v73_v1, %v72_v0  ;;  %v69_v4 = vld [vmem:[#allocation3 + $0x8] sm:$0xff]  ;;  %v74_v5 = vld [vmem:[#allocation3 + $0x30] sm:$0xff]  ;;  %67 = vst.msk [vmem:[#allocation2] sm:$0xff] %vm66_vm0, %v679_v48  ;;  %vm176_vm1 = vcmask 130112   ;;  %vm241_vm2 = vcmask 1041409  }
  0x3b   :  { %v75_v6 = vld [vmem:[#allocation3 + $0x38] sm:$0xff]  ;;  %v101_v7 = vadd.f32 %v69_v4, %v68_v2  ;;  %v70_v8 = vld [vmem:[#allocation3 + $0x10] sm:$0xff]  ;;  %v76_v14 = vld [vmem:[#allocation3 + $0x40] sm:$0xff]  ;;  %v166_v56 = vand.u32 127, %v165_v53  ;;  %v168_v60 = vshrl.u32 %v165_v53, 7  ;;  %vm243_vm3 = vcmask 1042434  }
  0x3c   :  { %v71_v9 = vld [vmem:[#allocation3 + $0x18] sm:$0xff]  ;;  %108 = vadd.xlane.f32.xlu1 %v107_v3  ;;  %v110_v10 = vadd.f32 %v75_v6, %v74_v5  ;;  %v78_v12 = vld [vmem:[#allocation3 + $0x50] sm:$0xff]  ;;  %v77_v15 = vld [vmem:[#allocation3 + $0x48] sm:$0xff]  ;;  %vm245_vm4 = vcmask 1043459   ;;  %vm247_vm5 = vcmask 1044484   ;;  %vm249_vm6 = vcmask 1045509  }
  0x3d   :  { %102 = vadd.xlane.f32.xlu0 %v101_v7  ;;  %v104_v11 = vadd.f32 %v71_v9, %v70_v8  ;;  %v79_v13 = vld [vmem:[#allocation3 + $0x58] sm:$0xff]  ;;  %v113_v17 = vadd.f32 %v77_v15, %v76_v14  ;;  %v82_v18 = vld [vmem:[#allocation3 + $0x70] sm:$0xff]  ;;  %v80_v20 = vld [vmem:[#allocation3 + $0x60] sm:$0xff]  ;;  %v171_v57 = vadd.s32 4294967288, %v166_v56  ;;  %v169_v0 = vsub.s32 %v166_v56, %v168_v60  ;;  %s682_s10 = smov [#allocation9]  }
  0x3e   :  { %v116_v16 = vadd.f32 %v79_v13, %v78_v12  ;;  %v83_v19 = vld [vmem:[#allocation3 + $0x78] sm:$0xff]  ;;  %v81_v21 = vld [vmem:[#allocation3 + $0x68] sm:$0xff]  ;;  %v86_v24 = vld [vmem:[#allocation3 + $0x90] sm:$0xff]  ;;  %vm251_vm7 = vcmask 1046534   ;;  %vm253_vm8 = vcmask 1047559   ;;  %vm681_vm9 = vmmov 0  }
  0x3f   :  { %v122_v22 = vadd.f32 %v83_v19, %v82_v18  ;;  %v119_v23 = vadd.f32 %v81_v21, %v80_v20  ;;  %v87_v25 = vld [vmem:[#allocation3 + $0x98] sm:$0xff]  ;;  %v84_v26 = vld [vmem:[#allocation3 + $0x80] sm:$0xff]  ;;  %v85_v27 = vld [vmem:[#allocation3 + $0x88] sm:$0xff]  ;;  %v174_v61 = vsub.s32 %v171_v57, %v168_v60  ;;  %498 = vmatprep.mubr.msk.f32.mxu0 %vm681_vm9, %v679_v48  ;;  %533 = vmatprep.mubr.msk.f32.mxu1 %vm681_vm9, %v679_v48  ;;  %s461_s11 = sshll.u32 %s682_s10, 4  ;;  %s462_s11 = int_to_ptr.vmem [resolvable:$true] %s461_s11 }
  0x40   :  { %111 = vadd.xlane.f32.xlu1 %v110_v10  ;;  %v128_v28 = vadd.f32 %v87_v25, %v86_v24  ;;  %v125_v29 = vadd.f32 %v85_v27, %v84_v26  ;;  %v90_v30 = vld [vmem:[#allocation3 + $0xb0] sm:$0xff]  ;;  %v91_v31 = vld [vmem:[#allocation3 + $0xb8] sm:$0xff]  ;;  %v88_v32 = vld [vmem:[#allocation3 + $0xa0] sm:$0xff]  ;;  %s644_s12 = scalar_lea.vmem %s462_s11, 128  ;;  %p649_p11 = scmp.lt.s32.totalorder %s462_s11, %s462_s11 }
  0x41   :  { %105 = vadd.xlane.f32.xlu0 %v104_v11  ;;  %v89_v33 = vld [vmem:[#allocation3 + $0xa8] sm:$0xff]  ;;  %v134_v34 = vadd.f32 %v91_v31, %v90_v30  ;;  %v94_v36 = vld [vmem:[#allocation3 + $0xd0] sm:$0xff]  ;;  %v95_v37 = vld [vmem:[#allocation3 + $0xd8] sm:$0xff]  ;;  %p645_p10 = scmp.ne.s32.totalorder %s462_s11, %s644_s12  ;;  %p650_p12 = scmp.lt.s32.totalorder %s644_s12, %s644_s12 }
  0x42   :  { %v131_v35 = vadd.f32 %v89_v33, %v88_v32  ;;  %v92_v38 = vld [vmem:[#allocation3 + $0xc0] sm:$0xff]  ;;  %v93_v39 = vld [vmem:[#allocation3 + $0xc8] sm:$0xff]  ;;  %v140_v40 = vadd.f32 %v95_v37, %v94_v36  ;;  %v98_v42 = vld [vmem:[#allocation3 + $0xf0] sm:$0xff] }
  0x43   :  { %v137_v41 = vadd.f32 %v93_v39, %v92_v38  ;;  %v99_v43 = vld [vmem:[#allocation3 + $0xf8] sm:$0xff]  ;;  %v96_v44 = vld [vmem:[#allocation3 + $0xe0] sm:$0xff]  ;;  %v97_v45 = vld [vmem:[#allocation3 + $0xe8] sm:$0xff]  ;;  %p651_p13 = por %p650_p12, %p649_p11 }
  0x44   :  { %117 = vadd.xlane.f32.xlu1 %v116_v16  ;;  %v146_v46 = vadd.f32 %v99_v43, %v98_v42  ;;  %v143_v47 = vadd.f32 %v97_v45, %v96_v44  ;;  %v361_v53 = vld [vmem:[#allocation8] sm:$0xff]  ;;  %v364_v57 = vld [vmem:[#allocation8 + $0x18] sm:$0xff]  ;;  %v366_v60 = vld [vmem:[#allocation8 + $0x28] sm:$0xff] }
  0x45   :  { %114 = vadd.xlane.f32.xlu0 %v113_v17  ;;  %v369_v48 = vld [vmem:[#allocation8 + $0x40] sm:$0xff]  ;;  %p652_p0 = pnand %p651_p13, %p645_p10 }
  0x48   :  { %123 = vadd.xlane.f32.xlu1 %v122_v22 }
  0x49   :  { %120 = vadd.xlane.f32.xlu0 %v119_v23 }
  0x4c   :  { %129 = vadd.xlane.f32.xlu1 %v128_v28 }
  0x4d   :  { %126 = vadd.xlane.f32.xlu0 %v125_v29 }
  0x50   :  { %135 = vadd.xlane.f32.xlu1 %v134_v34 }
  0x51   :  { %132 = vadd.xlane.f32.xlu0 %v131_v35  ;;  %v100_v35 = vld [vmem:[#allocation2] sm:$0xff] }
  0x54   :  { %141 = vadd.xlane.f32.xlu1 %v140_v40 }
  0x55   :  { %138 = vadd.xlane.f32.xlu0 %v137_v41 }
  0x58   :  { %147 = vadd.xlane.f32.xlu1 %v146_v46 }
  0x59   :  { %144 = vadd.xlane.f32.xlu0 %v143_v47 }
  0xc9   :  { %v109_v49 = vpop.xlane.xlu1 %108 }
  0xca   :  { %v103_v50 = vpop.xlane.xlu0 %102  ;;  %v181_v7 = vrot.slane %v109_v49, %v169_v0  ;;  %v278_v49 = vld [vmem:[#allocation6] sm:$0xff] }
  0xcb   :  { %v170_v8 = vrot.slane %v103_v50, %v169_v0  ;;  %v279_v50 = vld [vmem:[#allocation6 + $0x8] sm:$0xff] }
  0xcd   :  { %v112_v51 = vpop.xlane.xlu1 %111 }
  0xce   :  { %v106_v52 = vpop.xlane.xlu0 %105  ;;  %v185_v1 = vrot.slane %v112_v51, %v174_v61  ;;  %v680_v51 = vmov 0.0|0.0  }
  0xcf   :  { %v175_v2 = vrot.slane %v106_v52, %v174_v61  ;;  %536 = vmatprep.subr.bf16.mxu0 %v680_v51  ;;  %v537_v52 = vpack.c.bf16 %v279_v50, %v278_v49  ;;  %539 = vmatprep.subr.bf16.mxu1 %v680_v51 }
  0xd0   :  { %v186_v13 = vsel %vm176_vm1, %v185_v1, %v181_v7  ;;  %v370_v1 = vld [vmem:[#allocation8 + $0x48] sm:$0xff] }
  0xd1   :  { %v118_v54 = vpop.xlane.xlu1 %117  ;;  %v177_v14 = vsel %vm176_vm1, %v175_v2, %v170_v8  ;;  %538 = vmatpush3.bf16.msra.mxu0 %v537_v52  ;;  %v552_v2 = vpack.c.bf16 %v370_v1, %v369_v48  ;;  %v371_v8 = vld [vmem:[#allocation8 + $0x50] sm:$0xff] }
  0xd2   :  { %v115_v55 = vpop.xlane.xlu0 %114  ;;  %v194_v4 = vrot.slane %v118_v54, %v174_v61  ;;  %v242_v23 = vsel %vm241_vm2, %v186_v13, %v177_v14  ;;  %v362_v54 = vld [vmem:[#allocation8 + $0x8] sm:$0xff]  ;;  %v375_v14 = vld [vmem:[#allocation8 + $0x70] sm:$0xff] }
  0xd3   :  { %v190_v5 = vrot.slane %v115_v55, %v169_v0  ;;  %v363_v55 = vld [vmem:[#allocation8 + $0x10] sm:$0xff]  ;;  %v540_v56 = vpack.c.bf16 %v362_v54, %v361_v53 }
  0xd5   :  { %v124_v58 = vpop.xlane.xlu1 %123  ;;  %v195_v18 = vsel %vm176_vm1, %v194_v4, %v190_v5  ;;  %541 = vmatpush3.bf16.msra.mxu1 %v540_v56 }
  0xd6   :  { %v121_v59 = vpop.xlane.xlu0 %120  ;;  %v203_v9 = vrot.slane %v124_v58, %v174_v61  ;;  %v244_v25 = vsel %vm243_vm3, %v195_v18, %v242_v23  ;;  %v543_v58 = vpack.c.bf16 %v364_v57, %v363_v55  ;;  %542 = vmatprep.subr.bf16.mxu1 %v680_v51 }
  0xd7   :  { %v199_v10 = vrot.slane %v121_v59, %v169_v0  ;;  %v365_v59 = vld [vmem:[#allocation8 + $0x20] sm:$0xff] }
  0xd9   :  { %v130_v62 = vpop.xlane.xlu1 %129  ;;  %v204_v21 = vsel %vm176_vm1, %v203_v9, %v199_v10  ;;  %544 = vmatpush3.bf16.msra.mxu1 %v543_v58  ;;  %v372_v9 = vld [vmem:[#allocation8 + $0x58] sm:$0xff] }
  0xda   :  { %v127_v63 = vpop.xlane.xlu0 %126  ;;  %v212_v11 = vrot.slane %v130_v62, %v174_v61  ;;  %v246_v28 = vsel %vm245_vm4, %v204_v21, %v244_v25  ;;  %545 = vmatprep.subr.bf16.mxu1 %v680_v51  ;;  %v367_v62 = vld [vmem:[#allocation8 + $0x30] sm:$0xff]  ;;  %v555_v10 = vpack.c.bf16 %v372_v9, %v371_v8 }
  0xdb   :  { %v208_v12 = vrot.slane %v127_v63, %v169_v0  ;;  %v368_v63 = vld [vmem:[#allocation8 + $0x38] sm:$0xff] }
  0xdd   :  { %v136_v3 = vpop.xlane.xlu1 %135  ;;  %v213_v24 = vsel %vm176_vm1, %v212_v11, %v208_v12  ;;  %v373_v11 = vld [vmem:[#allocation8 + $0x60] sm:$0xff]  ;;  %v374_v12 = vld [vmem:[#allocation8 + $0x68] sm:$0xff] }
  0xde   :  { %v133_v6 = vpop.xlane.xlu0 %132  ;;  %v221_v15 = vrot.slane %v136_v3, %v174_v61  ;;  %v248_v32 = vsel %vm247_vm5, %v213_v24, %v246_v28  ;;  %v558_v13 = vpack.c.bf16 %v374_v12, %v373_v11 }
  0xdf   :  { %v217_v16 = vrot.slane %v133_v6, %v169_v0 }
  0xe1   :  { %v142_v17 = vpop.xlane.xlu1 %141  ;;  %v222_v26 = vsel %vm176_vm1, %v221_v15, %v217_v16  ;;  %v376_v15 = vld [vmem:[#allocation8 + $0x78] sm:$0xff] }
  0xe2   :  { %v230_v19 = vrot.slane %v142_v17, %v174_v61  ;;  %v139_v20 = vpop.xlane.xlu0 %138  ;;  %v250_v34 = vsel %vm249_vm6, %v222_v26, %v248_v32  ;;  %v561_v16 = vpack.c.bf16 %v376_v15, %v375_v14  ;;  %v471_v17 = vld [vmem:[%s791_s2] ss:$0 sm:$0xff] }
  0xe3   :  { %v226_v22 = vrot.slane %v139_v20, %v169_v0 }
  0xe5   :  { %v148_v27 = vpop.xlane.xlu1 %147  ;;  %v231_v29 = vsel %vm176_vm1, %v230_v19, %v226_v22  ;;  %v473_v22 = vld [vmem:[%s793_s4] ss:$0 sm:$0xff] }
  0xe6   :  { %v239_v30 = vrot.slane %v148_v27, %v174_v61  ;;  %v145_v31 = vpop.xlane.xlu0 %144  ;;  %v252_v36 = vsel %vm251_vm7, %v231_v29, %v250_v34  ;;  %v546_v61 = vpack.c.bf16 %v366_v60, %v365_v59 }
  0xe7   :  { %v235_v33 = vrot.slane %v145_v31, %v169_v0  ;;  %v549_v0 = vpack.c.bf16 %v368_v63, %v367_v62 }
  0xe8   :  { %547 = vmatpush3.bf16.msra.mxu1 %v546_v61 }
  0xe9   :  { %v240_v37 = vsel %vm176_vm1, %v239_v30, %v235_v33  ;;  %548 = vmatprep.subr.bf16.mxu1 %v680_v51 }
  0xea   :  { %v254_v38 = vsel %vm253_vm8, %v240_v37, %v252_v36 }
  0xeb   :  { %v256_v39 = vadd.f32 %v254_v38, %v100_v35 }
  0xec   :  { %550 = vmatpush3.bf16.msra.mxu1 %v549_v0 }
  0xed   :  { %258 = vst.msk [vmem:[#allocation2] sm:$0xff] %vm66_vm0, %v256_v39  ;;  %551 = vmatprep.subr.bf16.mxu1 %v680_v51 }
  0xf0   :  { %553 = vmatpush3.bf16.msra.mxu1 %v552_v2 }
  0xf1   :  { %554 = vmatprep.subr.bf16.mxu1 %v680_v51 }
  0xf4   :  { %v262_v40 = vld [vmem:[#allocation2] sm:$0xff]  ;;  %556 = vmatpush3.bf16.msra.mxu1 %v555_v10 }
  0xf5   :  { %v263_v41 = vmul.f32 0.00390625, %v262_v40  ;;  %557 = vmatprep.subr.bf16.mxu1 %v680_v51 }
  0xf7   :  { %v264_v42 = vsel %vm66_vm0, %v263_v41, 0.0 }
  0xf8   :  { %265 = vadd.xlane.f32.xlu0 %v264_v42  ;;  %559 = vmatpush3.bf16.msra.mxu1 %v558_v13 }
  0xf9   :  { %560 = vmatprep.subr.bf16.mxu1 %v680_v51 }
  0xfc   :  { %562 = vmatpush3.bf16.msra.mxu1 %v561_v16 }
 0x185   :  { %v266_v43 = vpop.xlane.xlu0 %265 }
 0x186   :  { %v268_v44 = vmul.f32 0.0625, %v266_v43 }
 0x188   :  { %v269_v45 = vsub.f32 %v263_v41, %v268_v44 }
 0x18a   :  { %v270_v46 = vmul.f32 %v269_v45, %v269_v45 }
 0x18c   :  { %v271_v47 = vsel %vm66_vm0, %v270_v46, 0.0 }
 0x18d   :  { %272 = vadd.xlane.f32.xlu1 %v271_v47 }
 0x21a   :  { %v273_v3 = vpop.xlane.xlu1 %272 }
 0x21b   :  { %v274_v4 = vmul.f32 0.0625, %v273_v3 }
 0x21d   :  { %v275_v5 = vadd.f32 1e-06, %v274_v4 }
 0x21f   :  { %574 = vrsqrt.f32 %v275_v5 }
 0x229   :  { %v575_v6 = vpop.eup %574 }
 0x22a   :  { %v277_v7 = vmul.f32 %v575_v6, %v269_v45 }
 0x22c   :  { %499 = vmatmul.mubr.msk.f32.vlgmr.msra.gmra.mrb[0].mxu0 %vm66_vm0, %v277_v7 }
 0x2ff   :  { %v356_v18 = vpop.f32.mrb[0].mxu0 }
 0x300   :  { %v357_v19 = vadd.f32 %v471_v17, %v356_v18  ;;  %v500_v20 = vpop.f32.mrb[1].mxu0 }
 0x302   :  { %576 = vtanh.f32 %v357_v19 }
 0x30c   :  { %v577_v21 = vpop.eup %576 }
 0x30d   :  { %534 = vmatmul.mubr.f32.vlgmr.msra.gmra.mrb[0].mxu1 %v577_v21 }
 0x3e0   :  { %v450_v23 = vpop.f32.mrb[0].mxu1 }
 0x3e1   :  { %v451_v24 = vadd.f32 %v473_v22, %v450_v23  ;;  %v535_v25 = vpop.f32.mrb[1].mxu1 }
 0x3e3   :  { %454 = vst [vmem:[#allocation9] sm:$0xff] %v451_v24 }
 0x3e4   :  { %655 = shalt.err (!%p652_p0)
}
 0x3e5   :  { %s656_s14 = scalar_lea.hbm %s794_s5, 128 }
 0x3e6   :  { %p657_p1 = scmp.ne.s32.totalorder %s794_s5, %s656_s14  ;;  %p660_p2 = scmp.lt.u32.totalorder %s656_s14, %s794_s5 }
 0x3e8   :  { %p662_p3 = pnand %p660_p2, %p657_p1 }
 0x3ea   :  { %665 = shalt.err (!%p662_p3)
}
 0x3eb   :  { %464 = dma.vmem_to_hbm [thread:$0]  %s462_s11, 128, %s794_s5, [#allocation5]  }
 0x3ec   :  { %670 = dma.done.wait [#allocation5], 128  }
 0x3ed   :  { %671 = vsyncadd [#allocation5], 4294967168 }
 0x3ee   :  { %468 = vsyncpa [#allocation4], 1 }
 0x3ef   :  { %469 = vsyncpa [#allocation7], 1 }
 0x3f0   :  { %470 = vsyncpa [#allocation5], 1 }

</bundles_post_ra>
